<compile_context>
chip_gen: v5e
topology: v5e:2x2
jax: 0.10.0
libtpu: 0.0.40
codegen_flags: <defaults>
</compile_context>

<pallas_src>
import math
import numpy as np

import jax
import jax.numpy as jnp
from jax.experimental import pallas as pl
from jax.experimental.pallas import tpu as pltpu


def _round_up(x, m):
    return ((x + m - 1) // m) * m


def _gemm_bias_leaky_kernel(x_ref, w_ref, b_ref, o_ref, acc_ref):
    """Computes one (tm, tn) output tile: leaky_relu(x @ w + b), K reduced over grid axis 2."""
    k = pl.program_id(2)

    @pl.when(k == 0)
    def _():
        acc_ref[...] = jnp.zeros_like(acc_ref)

    acc_ref[...] += jnp.dot(
        x_ref[...], w_ref[...], preferred_element_type=jnp.float32
    )

    @pl.when(k == pl.num_programs(2) - 1)
    def _():
        y = acc_ref[...] + b_ref[...]          # (tm, tn) + (1, tn) broadcast
        y = jnp.maximum(y, 0.01 * y)           # LeakyReLU(negative_slope=0.01)
        o_ref[...] = y.astype(o_ref.dtype)


def _fused_gemm_bias_leaky(x_col, w_col, bias_row, *, tm=256, tn=128, tk=512,
                           compute_dtype=None):
    """leaky_relu(x_col @ w_col + bias_row).

    x_col: (M, K), w_col: (K, N), bias_row: (1, N). Pads M/N/K for aligned, lane-dense
    tiles, runs the fused Pallas GEMM, and slices the padding back off.
    Set compute_dtype=jnp.bfloat16 for the bf16-input / f32-accumulate MXU path (v6e/v7x).
    """
    M, K = x_col.shape
    Kw, N = w_col.shape
    assert K == Kw
    out_dtype = x_col.dtype

    tm = min(tm, _round_up(M, 8))
    tn = min(tn, _round_up(N, 128))
    tk = min(tk, _round_up(K, 128))
    M_pad = _round_up(M, tm)
    N_pad = _round_up(N, tn)
    K_pad = _round_up(K, tk)

    x_p = jnp.pad(x_col, ((0, M_pad - M), (0, K_pad - K)))
    w_p = jnp.pad(w_col, ((0, K_pad - K), (0, N_pad - N)))
    b_p = jnp.pad(bias_row, ((0, 0), (0, N_pad - N))).astype(jnp.float32)

    if compute_dtype is not None:
        x_p = x_p.astype(compute_dtype)
        w_p = w_p.astype(compute_dtype)

    grid = (M_pad // tm, N_pad // tn, K_pad // tk)

    out = pl.pallas_call(
        _gemm_bias_leaky_kernel,
        out_shape=jax.ShapeDtypeStruct((M_pad, N_pad), out_dtype),
        grid_spec=pltpu.PrefetchScalarGridSpec(
            num_scalar_prefetch=0,
            grid=grid,
            in_specs=[
                pl.BlockSpec((tm, tk), lambda i, j, k: (i, k)),
                pl.BlockSpec((tk, tn), lambda i, j, k: (k, j)),
                pl.BlockSpec((1, tn), lambda i, j, k: (0, j)),
            ],
            out_specs=pl.BlockSpec((tm, tn), lambda i, j, k: (i, j)),
            scratch_shapes=[pltpu.VMEM((tm, tn), jnp.float32)],
        ),
        compiler_params=pltpu.CompilerParams(
            dimension_semantics=("parallel", "parallel", "arbitrary"),
        ),
        cost_estimate=pl.CostEstimate(
            flops=2 * M_pad * N_pad * K_pad,
            transcendentals=0,
            bytes_accessed=4 * (M_pad * K_pad + K_pad * N_pad + N_pad + M_pad * N_pad),
        ),
    )(x_p, w_p, b_p)

    return out[:M, :N]


def tconv_bn_leaky(x, weight, bias, gamma, beta, running_mean, running_var, *,
                   stride=1, padding=0, output_padding=0, dilation=1, eps=1e-5,
                   compute_dtype=None):
    """Forward of TconvBNLeaky (ConvTranspose2d(groups=1) -> BatchNorm2d(eval) -> LeakyReLU(0.01)).

    x:      (N, Cin, H, W)       float32, NCHW (PyTorch layout)
    weight: (Cin, Cout, kH, kW)  PyTorch ConvTranspose2d weight layout
    bias:   (Cout,) or None
    gamma, beta, running_mean, running_var: (Cout,)
    """
    Nb, Cin, H, W = x.shape
    Cin_w, Cout, kH, kW = weight.shape
    assert Cin == Cin_w, "groups != 1 not supported"

    s, p, op, d = stride, padding, output_padding, dilation
    H_out = (H - 1) * s - 2 * p + d * (kH - 1) + op + 1
    W_out = (W - 1) * s - 2 * p + d * (kW - 1) + op + 1

    # ---- Fold eval-mode BatchNorm into weight/bias (one-off plain-JAX glue).
    scale = gamma / jnp.sqrt(running_var + eps)                       # (Cout,)
    w_eff = weight * scale[None, :, None, None]                       # (Cin, Cout, kH, kW)
    b_conv = bias if bias is not None else jnp.zeros((Cout,), x.dtype)
    b_eff = (b_conv - running_mean) * scale + beta                    # (Cout,)

    # ---- Transposed conv == stride-1 conv of the zero-dilated, padded input with the
    #      spatially flipped kernel.
    x_nhwc = jnp.transpose(x, (0, 2, 3, 1))                           # (N, H, W, Cin)
    H_up = (H - 1) * s + 1
    W_up = (W - 1) * s + 1
    x_up = jnp.zeros((Nb, H_up, W_up, Cin), x.dtype)
    x_up = x_up.at[:, ::s, ::s, :].set(x_nhwc)

    pt = d * (kH - 1) - p
    pb = d * (kH - 1) - p + op
    pw0 = d * (kW - 1) - p
    pw1 = d * (kW - 1) - p + op
    x_pad = jnp.pad(x_up, ((0, 0),
                           (max(pt, 0), max(pb, 0)),
                           (max(pw0, 0), max(pw1, 0)),
                           (0, 0)))
    # Negative effective padding (p > d*(k-1)) means cropping instead.
    x_pad = x_pad[:,
                  max(-pt, 0): x_pad.shape[1] - max(-pb, 0),
                  max(-pw0, 0): x_pad.shape[2] - max(-pw1, 0),
                  :]

    # Flipped kernel; K axis ordered (kh, kw, cin) to match the im2col layout below.
    w_flip = w_eff[:, :, ::-1, ::-1]                                  # (Cin, Cout, kH, kW)
    w_col = jnp.transpose(w_flip, (2, 3, 0, 1)).reshape(kH * kW * Cin, Cout)

    # im2col: static shifted windows of the padded input (plain-JAX glue).
    patches = []
    for kh in range(kH):
        for kw in range(kW):
            patches.append(x_pad[:, kh * d: kh * d + H_out, kw * d: kw * d + W_out, :])
    x_col = jnp.stack(patches, axis=3)                                # (N, Ho, Wo, kH*kW, Cin)
    x_col = x_col.reshape(Nb * H_out * W_out, kH * kW * Cin)

    # ---- Fused GEMM + bias + LeakyReLU on the MXU (Pallas).
    out_col = _fused_gemm_bias_leaky(x_col, w_col, b_eff.reshape(1, Cout),
                                     compute_dtype=compute_dtype)

    out = out_col.reshape(Nb, H_out, W_out, Cout)
    return jnp.transpose(out, (0, 3, 1, 2))                           # back to NCHW


def _ref_forward(x, w, b, gamma, beta, mean, var, eps, s, p, op, d):
    """Independent numpy reference: scatter-form transposed conv + BN(eval) + LeakyReLU."""
    x = np.asarray(x); w = np.asarray(w); b = np.asarray(b)
    gamma = np.asarray(gamma); beta = np.asarray(beta)
    mean = np.asarray(mean); var = np.asarray(var)
    Nb, Cin, H, W = x.shape
    _, Cout, kH, kW = w.shape
    H_out = (H - 1) * s - 2 * p + d * (kH - 1) + op + 1
    W_out = (W - 1) * s - 2 * p + d * (kW - 1) + op + 1
    H_full = max((H - 1) * s + (kH - 1) * d + 1, p + H_out)
    W_full = max((W - 1) * s + (kW - 1) * d + 1, p + W_out)
    y = np.zeros((Nb, Cout, H_full, W_full), np.float64)
    for n in range(Nb):
        for ci in range(Cin):
            for h in range(H):
                for wi in range(W):
                    v = x[n, ci, h, wi]
                    for kh in range(kH):
                        for kw in range(kW):
                            y[n, :, h * s + kh * d, wi * s + kw * d] += v * w[ci, :, kh, kw]
    y = y[:, :, p:p + H_out, p:p + W_out]
    y = y + b[None, :, None, None]
    y = (y - mean[None, :, None, None]) / np.sqrt(var[None, :, None, None] + eps) \
        * gamma[None, :, None, None] + beta[None, :, None, None]
    return np.where(y >= 0, y, 0.01 * y).astype(np.float32)


if __name__ == "__main__":
    # Small shapes consistent with the module: a typical 2x-upsampling block.
    batch, in_ch, out_ch = 2, 4, 8
    H = W = 16
    kernel_size, stride, padding, output_padding, dilation = 3, 2, 1, 1, 1

    key = jax.random.PRNGKey(0)
    kx, kw, kb, kg, kbt, km, kv = jax.random.split(key, 7)

    bound = 1.0 / math.sqrt(in_ch * kernel_size * kernel_size)
    weight = jax.random.uniform(kw, (in_ch, out_ch, kernel_size, kernel_size),
                                jnp.float32, -bound, bound)
    bias = jax.random.uniform(kb, (out_ch,), jnp.float32, -bound, bound)
    gamma = jax.random.uniform(kg, (out_ch,), jnp.float32, 0.5, 1.5)
    beta = 0.1 * jax.random.normal(kbt, (out_ch,), jnp.float32)
    running_mean = 0.1 * jax.random.normal(km, (out_ch,), jnp.float32)
    running_var = jax.random.uniform(kv, (out_ch,), jnp.float32, 0.5, 1.5)
    x = jax.random.normal(kx, (batch, in_ch, H, W), jnp.float32)

    out = tconv_bn_leaky(x, weight, bias, gamma, beta, running_mean, running_var,
                         stride=stride, padding=padding,
                         output_padding=output_padding, dilation=dilation)
    out = jax.block_until_ready(out)

    H_out = (H - 1) * stride - 2 * padding + dilation * (kernel_size - 1) + output_padding + 1
    W_out = (W - 1) * stride - 2 * padding + dilation * (kernel_size - 1) + output_padding + 1
    assert out.shape == (batch, out_ch, H_out, W_out), out.shape

    ref = _ref_forward(x, weight, bias, gamma, beta, running_mean, running_var,
                       1e-5, stride, padding, output_padding, dilation)
    np.testing.assert_allclose(np.asarray(out), ref, atol=1e-4, rtol=1e-4)

    print("KERNEL_OK")
</pallas_src>

<mosaic_0001>
module attributes {stable_mosaic.version = 11 : i64} {
  func.func @_gemm_bias_leaky_kernel(%arg0: i32, %arg1: i32, %arg2: i32, %arg3: memref<256x128xf32, #tpu.memory_space<vmem>>, %arg4: memref<128x128xf32, #tpu.memory_space<vmem>>, %arg5: memref<1x128xf32, #tpu.memory_space<vmem>>, %arg6: memref<256x128xf32, #tpu.memory_space<vmem>>, %arg7: memref<256x128xf32, #tpu.memory_space<vmem>>) attributes {dimension_semantics = [#tpu.dimension_semantics<parallel>, #tpu.dimension_semantics<parallel>, #tpu.dimension_semantics<arbitrary>], iteration_bounds = array<i64: 8, 1, 1>, scalar_prefetch = 0 : i64, scratch_operands = 1 : i64, tpu.core_type = #tpu.core_type<tc>, window_params = [{transform_indices = @transform_0, window_bounds = array<i64: 256, 128>}, {transform_indices = @transform_1, window_bounds = array<i64: 128, 128>}, {transform_indices = @transform_2, window_bounds = array<i64: 1, 128>}, {transform_indices = @transform_3, window_bounds = array<i64: 256, 128>}]} {
    %c0_i32 = arith.constant 0 : i32
    %0 = arith.cmpi eq, %arg2, %c0_i32 : i32
    %1 = arith.extui %0 : i1 to i32
    %c0_i32_0 = arith.constant 0 : i32
    %2 = arith.cmpi ne, %1, %c0_i32_0 : i32
    scf.if %2 {
      %cst_10 = arith.constant 0.000000e+00 : f32
      %12 = vector.broadcast %cst_10 : f32 to vector<256x128xf32>
      %c0_11 = arith.constant 0 : index
      %c0_12 = arith.constant 0 : index
      %13 = vector.load %arg7[%c0_11, %c0_12] : memref<256x128xf32, #tpu.memory_space<vmem>>, vector<256x128xf32>
      tpu.vector_store %arg7[%c0_11, %c0_12], %12 {strides = array<i32>} : memref<256x128xf32, #tpu.memory_space<vmem>>, vector<256x128xf32>,
    } else {
    }
    %c0 = arith.constant 0 : index
    %c0_1 = arith.constant 0 : index
    %3 = vector.load %arg7[%c0, %c0_1] : memref<256x128xf32, #tpu.memory_space<vmem>>, vector<256x128xf32>
    %c0_2 = arith.constant 0 : index
    %c0_3 = arith.constant 0 : index
    %4 = vector.load %arg3[%c0_2, %c0_3] : memref<256x128xf32, #tpu.memory_space<vmem>>, vector<256x128xf32>
    %c0_4 = arith.constant 0 : index
    %c0_5 = arith.constant 0 : index
    %5 = vector.load %arg4[%c0_4, %c0_5] : memref<128x128xf32, #tpu.memory_space<vmem>>, vector<128x128xf32>
    %cst = arith.constant dense<0.000000e+00> : vector<256x128xf32>
    %6 = tpu.matmul %4, %5, %cst {dimension_numbers = #tpu.dot_dimension_numbers<[1], [0], [0], [1], [0, 0, 1, 1], [], []>} : vector<256x128xf32>, vector<128x128xf32>, vector<256x128xf32> -> vector<256x128xf32>
    %7 = arith.addf %3, %6 : vector<256x128xf32>
    %c0_6 = arith.constant 0 : index
    %c0_7 = arith.constant 0 : index
    %8 = vector.load %arg7[%c0_6, %c0_7] : memref<256x128xf32, #tpu.memory_space<vmem>>, vector<256x128xf32>
    tpu.vector_store %arg7[%c0_6, %c0_7], %7 {strides = array<i32>} : memref<256x128xf32, #tpu.memory_space<vmem>>, vector<256x128xf32>,
    %c0_i32_8 = arith.constant 0 : i32
    %9 = arith.cmpi eq, %arg2, %c0_i32_8 : i32
    %10 = arith.extui %9 : i1 to i32
    %c0_i32_9 = arith.constant 0 : i32
    %11 = arith.cmpi ne, %10, %c0_i32_9 : i32
    scf.if %11 {
      %c0_10 = arith.constant 0 : index
      %c0_11 = arith.constant 0 : index
      %12 = vector.load %arg7[%c0_10, %c0_11] : memref<256x128xf32, #tpu.memory_space<vmem>>, vector<256x128xf32>
      %c0_12 = arith.constant 0 : index
      %c0_13 = arith.constant 0 : index
      %13 = vector.load %arg5[%c0_12, %c0_13] : memref<1x128xf32, #tpu.memory_space<vmem>>, vector<1x128xf32>
      %14 = vector.broadcast %13 : vector<1x128xf32> to vector<256x128xf32>
      %15 = arith.addf %12, %14 : vector<256x128xf32>
      %cst_14 = arith.constant 0.00999999977 : f32
      %16 = vector.broadcast %cst_14 : f32 to vector<256x128xf32>
      %17 = arith.mulf %16, %15 : vector<256x128xf32>
      %18 = arith.maximumf %15, %17 : vector<256x128xf32>
      %c0_15 = arith.constant 0 : index
      %c0_16 = arith.constant 0 : index
      %19 = vector.load %arg6[%c0_15, %c0_16] : memref<256x128xf32, #tpu.memory_space<vmem>>, vector<256x128xf32>
      tpu.vector_store %arg6[%c0_15, %c0_16], %18 {strides = array<i32>} : memref<256x128xf32, #tpu.memory_space<vmem>>, vector<256x128xf32>,
    } else {
    }
    return
  }
  func.func @transform_0(%arg0: i32, %arg1: i32, %arg2: i32) -> (i32, i32) {
    %c0_i32 = arith.constant 0 : i32
    return %arg0, %arg2 : i32, i32
  }
  func.func @transform_1(%arg0: i32, %arg1: i32, %arg2: i32) -> (i32, i32) {
    %c0_i32 = arith.constant 0 : i32
    return %arg2, %arg1 : i32, i32
  }
  func.func @transform_2(%arg0: i32, %arg1: i32, %arg2: i32) -> (i32, i32) {
    %c0_i32 = arith.constant 0 : i32
    %c0_i32_0 = arith.constant 0 : i32
    return %c0_i32, %arg1 : i32, i32
  }
  func.func @transform_3(%arg0: i32, %arg1: i32, %arg2: i32) -> (i32, i32) {
    %c0_i32 = arith.constant 0 : i32
    return %arg0, %arg1 : i32, i32
  }
}

</mosaic_0001>

<bundles_post_ra>
// kernel: tpu_custom_call.1
= control target key start
LH: loop header
LB: loop body
LE: loop exit
PB: predicated region body
PF: predicated region fallthrough
CT: control target
= control target key end

     0   :  { %s1433_s0 = inlined_call_operand.hbm [shape: f32[2048,128], index: 0, kind: input, shape index: {}]   ;;  %s1434_s1 = inlined_call_operand.hbm [shape: f32[128,128], index: 1, kind: input, shape index: {}]   ;;  %s1435_s2 = inlined_call_operand.vmem [shape: f32[1,128], index: 2, kind: input, shape index: {}]   ;;  %s1436_s3 = inlined_call_operand.hbm [shape: f32[2048,128], index: 3, kind: output, shape index: {}]  }
   0x1   :  { %1438 = sst [smem:[#allocation12_spill]] %s1434_s1 }
   0x2   :  { %8 = vsyncpa [#allocation4], 0 }
   0x3   :  { %10 = vsyncpa [#allocation4 + $0x1], 0 }
   0x4   :  { %11 = vsyncpa [#allocation7], 0 }
   0x5   :  { %12 = vsyncpa [#allocation5], 0 }
   0x6   :  { %14 = vsyncpa [#allocation5 + $0x1], 0  ;;  %s1170_s12 = smov 0   ;;  %s1172_s13 = smov 0  }
   0x7   :  { %s1174_s14 = smov 0   ;;  %s1176_s15 = smov 0  }
   0x8   :  { %s1178_s16 = smov 0   ;;  %s1180_s17 = smov 0  }
   0x9 LB: > { %s851_s18 = sadd.s32 4294967295, %s1143_s17   ;;  %s852_s19 = sadd.s32 4294967294, %s1143_s17   ;;  %s1143_s17 = sphi %s1180_s17, %s20_s17   ;;  %s1139_s16 = sphi %s1178_s16, %s1452_s16   ;;  %s1135_s15 = sphi %s1176_s15, %s1451_s15   ;;  %s1131_s14 = sphi %s1174_s14, %s1450_s14   ;;  %s1127_s13 = sphi %s1172_s13, %s1449_s13   ;;  %s1123_s12 = sphi %s1170_s12, %s1448_s12  }
   0xa   : > { %p61_p0 = scmp.ne.s32.totalorder %s1127_s13, %s1123_s12  ;;  %p1204_p1 = scmp.eq.s32.totalorder %s851_s18, 0 }
   0xb   : > { %p1208_p2 = scmp.eq.s32.totalorder %s851_s18, 7  ;;  %p147_p3 = scmp.eq.s32.totalorder %s852_s19, 7 }
   0xc   : > { %p1214_p4 = por %p1204_p1, %p61_p0  ;;  %p853_p5 = scmp.ge.s32.totalorder %s1143_s17, 1 }
   0xd   : > { %p1219_p6 = por %p147_p3, %p61_p0  ;;  %p154_p7 = scmp.lt.s32.totalorder %s1143_s17, 9 }
   0xe   : > { %s1443_s1 = sld [smem:[#allocation12_spill]]  ;;  %s1145_s28 = smov [#allocation6]  }
   0xf   : > { %p1227_p8 = pnand %p853_p5, %p154_p7  ;;  %s171_s29 = sshll.u32 %s1145_s28, 4  ;;  %s172_s29 = int_to_ptr.vmem [resolvable:$true] %s171_s29 }
  0x10   : > { %s1437_s30 = smov 128   ;;  %s1147_s4 = smov 8  }
  0x11   : > { %p927_p9 = pneg %p1227_p8  ;;  %s39_s5 = sadd.s32 1, %s1139_s16 }
  0x12   : > { %p41_p11 = scmp.ge.s32.totalorder %s39_s5, 8  ;;  %s48_s6 = sadd.s32 1, %s1131_s14 }
  0x13   : > { %p928_p10 = pnand %p927_p9, %p1204_p1  ;;  %p55_p12 = scmp.ne.s32.totalorder %s1131_s14, %s1127_s13 }
  0x14   : > { %s169_s26 = sshll.u32 %s1443_s1, 4  ;;  %p56_p13 = scmp.eq.s32.totalorder %s1143_s17, 0  ;;  %s170_s26 = int_to_ptr.hbm [resolvable:$true] %s169_s26 }
  0x15   : > { %930 = dma.hbm_to_vmem [thread:$0]  (!%p928_p10), %s170_s26, 2048, %s172_s29, [#allocation7], %s1437_s30, %s1437_s30, %s1147_s4  }
  0x16   : > { %s1454_s5 = smov (%p41_p11, %s39_s5), 0  ;;  %p1245_p0 = por %p56_p13, %p55_p12 }
  0x17   : > { %p1251_p3 = por %p1208_p2, %p55_p12  ;;  %s43_s9 = ssub.s32 %s1139_s16, %s1454_s5 }
  0x18   : > { %p940_p5 = scmp.lt.s32.totalorder %s1143_s17, 8  ;;  %p46_p7 = scmp.eq.s32.totalorder %s43_s9, 0 }
  0x19   : > { %s191_s10 = sand.u32 1, %s1131_s14   ;;  %s869_s19 = sshll.u32 %s1139_s16, 8 }
  0x1a   : > { %s857_s11 = sshll.u32 %s191_s10, 8  ;;  %s201_s26 = scalar_lea.hbm %s1433_s0, %s869_s19 }
  0x1b   : > { %s1260_s18 = scalar_select %p46_p7, %s1131_s14, %s48_s6  }
  0x1c   : > { %s195_s28 = scalar_lea.vmem [#allocation3], %s857_s11  ;;  %s202_s21 = sshll.u32 %s201_s26, 4  ;;  %s203_s21 = int_to_ptr.hbm [resolvable:$true] %s202_s21 }
  0x1d   : > { %s204_s29 = sshll.u32 %s195_s28, 4  ;;  %p932_p2 = pnand %p940_p5, %p1245_p0  ;;  %s205_s29 = int_to_ptr.vmem [resolvable:$true] %s204_s29 }
  0x1e   : > { %s192_s30 = scalar_lea.sflag [#allocation4], %s191_s10  ;;  %s1447_s1 = smov 128  }
  0x1f   : > { %934 = dma.hbm_to_vmem [thread:$0]  (!%p932_p2), %s203_s21, 4096, %s205_s29, %s192_s30, %s1447_s1, %s1447_s1, %s1147_s4  }
  0x20   : > { %216 = sbr.rel (%p1227_p8) target bundleno = 271 (0x10f), region = 32  ;;  %s1274_s6 = sand.u32 (!%p1227_p8), 1, %s1127_s13  }
  0x21   : > { %s861_s9 = sshll.u32 (!%p1227_p8), %s1274_s6, 8  ;;  %s219_s11 = scalar_lea.sflag (!%p1227_p8), [#allocation4], %s1274_s6 }
  0x22   : > { %s1280_s7 = scalar_lea.vmem (!%p1227_p8), [#allocation3], %s861_s9 }
  0x25   : > { %1110 = dma.done.wait (%p1214_p4), %s219_s11, 4096  }
  0x26   : > { %1112 = vsyncadd (%p1214_p4), %s219_s11, 4294963200 }
  0x27   : > { %1114 = dma.done.wait (%p1204_p1), [#allocation7], 2048  }
  0x28   : > { %1116 = vsyncadd (%p1204_p1), [#allocation7], 4294965248  ;;  %v375_v0 = vld [vmem:[#allocation6 + $0x78] sm:$0xff]  ;;  %v374_v1 = vld [vmem:[#allocation6 + $0x70] sm:$0xff]  ;;  %s1333_s22 = scalar_lea.vmem [#allocation8], %s861_s9  ;;  %s870_s27 = sshll.u32 %s1135_s15, 8 }
  0x29   : > { %872 = vmatpush.msra.mxu2 %v375_v0  ;;  %873 = vmatpush.msra.mxu3 %v375_v0  ;;  %v373_v2 = vld [vmem:[#allocation6 + $0x68] sm:$0xff]  ;;  %v372_v3 = vld [vmem:[#allocation6 + $0x60] sm:$0xff]  ;;  %v371_v4 = vld [vmem:[#allocation6 + $0x58] sm:$0xff]  ;;  %s733_s10 = scalar_lea.hbm %s1436_s3, %s870_s27  ;;  %s734_s15 = sshll.u32 %s1333_s22, 4  ;;  %s735_s15 = int_to_ptr.vmem [resolvable:$true] %s734_s15 }
  0x2a   : > { %376 = vmatpush.msra.mxu0 %v375_v0  ;;  %871 = vmatpush.msra.mxu1 %v375_v0  ;;  %v370_v5 = vld [vmem:[#allocation6 + $0x50] sm:$0xff]  ;;  %v369_v6 = vld [vmem:[#allocation6 + $0x48] sm:$0xff]  ;;  %v368_v7 = vld [vmem:[#allocation6 + $0x40] sm:$0xff]  ;;  %s736_s19 = sshll.u32 %s733_s10, 4  ;;  %s721_s24 = scalar_lea.sflag [#allocation5], %s1274_s6  ;;  %s737_s19 = int_to_ptr.hbm [resolvable:$true] %s736_s19 }
  0x2b   : > { %875 = vmatpush.msra.mxu2 %v374_v1  ;;  %876 = vmatpush.msra.mxu3 %v374_v1  ;;  %v367_v8 = vld [vmem:[#allocation6 + $0x38] sm:$0xff]  ;;  %v366_v9 = vld [vmem:[#allocation6 + $0x30] sm:$0xff]  ;;  %v365_v10 = vld [vmem:[#allocation6 + $0x28] sm:$0xff]  ;;  %s1071_s25 = sshra.s32 %s737_s19, 4  ;;  %s1077_s21 = scalar_lea.hbm %s1436_s3, 2048  ;;  %s1072_s25 = int_to_ptr.hbm [resolvable:$true] %s1071_s25 }
  0x2c   : > { %377 = vmatpush.msra.mxu0 %v374_v1  ;;  %874 = vmatpush.msra.mxu1 %v374_v1  ;;  %v364_v11 = vld [vmem:[#allocation6 + $0x20] sm:$0xff]  ;;  %v363_v12 = vld [vmem:[#allocation6 + $0x18] sm:$0xff]  ;;  %v362_v13 = vld [vmem:[#allocation6 + $0x10] sm:$0xff]  ;;  %s1073_s26 = scalar_lea.hbm %s1072_s25, 256  ;;  %p1078_p9 = scmp.lt.s32.totalorder %s1072_s25, %s1436_s3 }
  0x2d   : > { %878 = vmatpush.msra.mxu2 %v373_v2  ;;  %879 = vmatpush.msra.mxu3 %v373_v2  ;;  %v361_v14 = vld [vmem:[#allocation6 + $0x8] sm:$0xff]  ;;  %v360_v15 = vld [vmem:[#allocation6] sm:$0xff]  ;;  %v346_v24 = vld [vmem:[%s1280_s7 + $0x90] sm:$0xff]  ;;  %p1074_p1 = scmp.ne.s32.totalorder %s1072_s25, %s1073_s26  ;;  %p1079_p10 = scmp.lt.s32.totalorder %s1077_s21, %s1073_s26 }
  0x2e   : > { %378 = vmatpush.msra.mxu0 %v373_v2  ;;  %877 = vmatpush.msra.mxu1 %v373_v2  ;;  %v344_v16 = vld [vmem:[%s1280_s7 + $0x80] sm:$0xff]  ;;  %v345_v20 = vld [vmem:[%s1280_s7 + $0x88] sm:$0xff]  ;;  %v354_v25 = vld [vmem:[%s1280_s7 + $0xd0] sm:$0xff] }
  0x2f   : > { %881 = vmatpush.msra.mxu2 %v372_v3  ;;  %882 = vmatpush.msra.mxu3 %v372_v3  ;;  %v352_v17 = vld [vmem:[%s1280_s7 + $0xc0] sm:$0xff]  ;;  %v353_v21 = vld [vmem:[%s1280_s7 + $0xc8] sm:$0xff]  ;;  %v330_v26 = vld [vmem:[%s1280_s7 + $0x10] sm:$0xff]  ;;  %p1075_p4 = pnand %p1074_p1, %p1251_p3  ;;  %p1080_p11 = por %p1079_p10, %p1078_p9 }
  0x30   : > { %379 = vmatpush.msra.mxu0 %v372_v3  ;;  %880 = vmatpush.msra.mxu1 %v372_v3  ;;  %v328_v18 = vld [vmem:[%s1280_s7] sm:$0xff]  ;;  %v329_v22 = vld [vmem:[%s1280_s7 + $0x8] sm:$0xff]  ;;  %v338_v27 = vld [vmem:[%s1280_s7 + $0x50] sm:$0xff] }
  0x31   : > { %884 = vmatpush.msra.mxu2 %v371_v4  ;;  %885 = vmatpush.msra.mxu3 %v371_v4  ;;  %v336_v19 = vld [vmem:[%s1280_s7 + $0x40] sm:$0xff]  ;;  %v337_v23 = vld [vmem:[%s1280_s7 + $0x48] sm:$0xff]  ;;  %v347_v28 = vld [vmem:[%s1280_s7 + $0x98] sm:$0xff]  ;;  %p1076_p8 = pneg %p1075_p4 }
  0x32   : > { %380 = vmatpush.msra.mxu0 %v371_v4  ;;  %883 = vmatpush.msra.mxu1 %v371_v4  ;;  %v355_v29 = vld [vmem:[%s1280_s7 + $0xd8] sm:$0xff]  ;;  %v348_v32 = vld [vmem:[%s1280_s7 + $0xa0] sm:$0xff]  ;;  %v349_v36 = vld [vmem:[%s1280_s7 + $0xa8] sm:$0xff] }
  0x33   : > { %887 = vmatpush.msra.mxu2 %v370_v5  ;;  %888 = vmatpush.msra.mxu3 %v370_v5  ;;  %v331_v30 = vld [vmem:[%s1280_s7 + $0x18] sm:$0xff]  ;;  %v356_v33 = vld [vmem:[%s1280_s7 + $0xe0] sm:$0xff]  ;;  %v357_v37 = vld [vmem:[%s1280_s7 + $0xe8] sm:$0xff]  ;;  %p1081_p12 = pnand %p1080_p11, %p1076_p8 }
  0x34   : > { %381 = vmatpush.msra.mxu0 %v370_v5  ;;  %886 = vmatpush.msra.mxu1 %v370_v5  ;;  %v339_v31 = vld [vmem:[%s1280_s7 + $0x58] sm:$0xff]  ;;  %v332_v34 = vld [vmem:[%s1280_s7 + $0x20] sm:$0xff]  ;;  %v333_v38 = vld [vmem:[%s1280_s7 + $0x28] sm:$0xff] }
  0x35   : > { %890 = vmatpush.msra.mxu2 %v369_v6  ;;  %891 = vmatpush.msra.mxu3 %v369_v6  ;;  %v340_v35 = vld [vmem:[%s1280_s7 + $0x60] sm:$0xff]  ;;  %v341_v39 = vld [vmem:[%s1280_s7 + $0x68] sm:$0xff]  ;;  %v350_v40 = vld [vmem:[%s1280_s7 + $0xb0] sm:$0xff] }
  0x36   : > { %382 = vmatpush.msra.mxu0 %v369_v6  ;;  %889 = vmatpush.msra.mxu1 %v369_v6  ;;  %v358_v41 = vld [vmem:[%s1280_s7 + $0xf0] sm:$0xff]  ;;  %v351_v44 = vld [vmem:[%s1280_s7 + $0xb8] sm:$0xff]  ;;  %v1325_v48 = vld [vmem:[%s1435_s2] ss:$0 sm:$0xff] }
  0x37   : > { %893 = vmatpush.msra.mxu2 %v368_v7  ;;  %894 = vmatpush.msra.mxu3 %v368_v7  ;;  %v334_v42 = vld [vmem:[%s1280_s7 + $0x30] sm:$0xff]  ;;  %v359_v45 = vld [vmem:[%s1280_s7 + $0xf8] sm:$0xff] }
  0x38   : > { %383 = vmatpush.msra.mxu0 %v368_v7  ;;  %892 = vmatpush.msra.mxu1 %v368_v7  ;;  %v342_v43 = vld [vmem:[%s1280_s7 + $0x70] sm:$0xff]  ;;  %v335_v46 = vld [vmem:[%s1280_s7 + $0x38] sm:$0xff] }
  0x39   : > { %896 = vmatpush.msra.mxu2 %v367_v8  ;;  %897 = vmatpush.msra.mxu3 %v367_v8  ;;  %v343_v47 = vld [vmem:[%s1280_s7 + $0x78] sm:$0xff] }
  0x3a   : > { %384 = vmatpush.msra.mxu0 %v367_v8  ;;  %895 = vmatpush.msra.mxu1 %v367_v8 }
  0x3b   : > { %899 = vmatpush.msra.mxu2 %v366_v9  ;;  %900 = vmatpush.msra.mxu3 %v366_v9 }
  0x3c   : > { %385 = vmatpush.msra.mxu0 %v366_v9  ;;  %898 = vmatpush.msra.mxu1 %v366_v9 }
  0x3d   : > { %902 = vmatpush.msra.mxu2 %v365_v10  ;;  %903 = vmatpush.msra.mxu3 %v365_v10 }
  0x3e   : > { %386 = vmatpush.msra.mxu0 %v365_v10  ;;  %901 = vmatpush.msra.mxu1 %v365_v10 }
  0x3f   : > { %905 = vmatpush.msra.mxu2 %v364_v11  ;;  %906 = vmatpush.msra.mxu3 %v364_v11 }
  0x40   : > { %387 = vmatpush.msra.mxu0 %v364_v11  ;;  %904 = vmatpush.msra.mxu1 %v364_v11 }
  0x41   : > { %908 = vmatpush.msra.mxu2 %v363_v12  ;;  %909 = vmatpush.msra.mxu3 %v363_v12 }
  0x42   : > { %388 = vmatpush.msra.mxu0 %v363_v12  ;;  %907 = vmatpush.msra.mxu1 %v363_v12 }
  0x43   : > { %911 = vmatpush.msra.mxu2 %v362_v13  ;;  %912 = vmatpush.msra.mxu3 %v362_v13 }
  0x44   : > { %389 = vmatpush.msra.mxu0 %v362_v13  ;;  %910 = vmatpush.msra.mxu1 %v362_v13 }
  0x45   : > { %914 = vmatpush.msra.mxu2 %v361_v14  ;;  %915 = vmatpush.msra.mxu3 %v361_v14 }
  0x46   : > { %390 = vmatpush.msra.mxu0 %v361_v14  ;;  %913 = vmatpush.msra.mxu1 %v361_v14 }
  0x47   : > { %917 = vmatpush.msra.mxu2 %v360_v15  ;;  %918 = vmatpush.msra.mxu3 %v360_v15 }
  0x48   : > { %440 = vmatmul.f32.vlgmr.msra.gmra.mxu2 %v344_v16  ;;  %464 = vmatmul.f32.vlgmr.msra.gmra.mxu3 %v352_v17 }
  0x49   : > { %391 = vmatpush.msra.mxu0 %v360_v15  ;;  %916 = vmatpush.msra.mxu1 %v360_v15 }
  0x4a   : > { %392 = vmatmul.f32.vlgmr.msra.gmra.mxu0 %v328_v18  ;;  %416 = vmatmul.f32.vlgmr.msra.gmra.mxu1 %v336_v19 }
  0x50   : > { %443 = vmatmul.f32.gmra.mxu2 %v345_v20  ;;  %467 = vmatmul.f32.gmra.mxu3 %v353_v21 }
  0x52   : > { %395 = vmatmul.f32.gmra.mxu0 %v329_v22  ;;  %419 = vmatmul.f32.gmra.mxu1 %v337_v23 }
  0x58   : > { %446 = vmatmul.f32.gmra.mxu2 %v346_v24  ;;  %470 = vmatmul.f32.gmra.mxu3 %v354_v25 }
  0x5a   : > { %398 = vmatmul.f32.gmra.mxu0 %v330_v26  ;;  %422 = vmatmul.f32.gmra.mxu1 %v338_v27 }
  0x60   : > { %449 = vmatmul.f32.gmra.mxu2 %v347_v28  ;;  %473 = vmatmul.f32.gmra.mxu3 %v355_v29 }
  0x62   : > { %401 = vmatmul.f32.gmra.mxu0 %v331_v30  ;;  %425 = vmatmul.f32.gmra.mxu1 %v339_v31 }
  0x68   : > { %452 = vmatmul.f32.gmra.mxu2 %v348_v32  ;;  %476 = vmatmul.f32.gmra.mxu3 %v356_v33 }
  0x6a   : > { %404 = vmatmul.f32.gmra.mxu0 %v332_v34  ;;  %428 = vmatmul.f32.gmra.mxu1 %v340_v35 }
  0x70   : > { %455 = vmatmul.f32.gmra.mxu2 %v349_v36  ;;  %479 = vmatmul.f32.gmra.mxu3 %v357_v37 }
  0x72   : > { %407 = vmatmul.f32.gmra.mxu0 %v333_v38  ;;  %431 = vmatmul.f32.gmra.mxu1 %v341_v39 }
  0x78   : > { %458 = vmatmul.f32.gmra.mxu2 %v350_v40  ;;  %482 = vmatmul.f32.gmra.mxu3 %v358_v41 }
  0x7a   : > { %410 = vmatmul.f32.gmra.mxu0 %v334_v42  ;;  %434 = vmatmul.f32.gmra.mxu1 %v342_v43 }
  0x80   : > { %461 = vmatmul.f32.gmra.mxu2 %v351_v44  ;;  %485 = vmatmul.f32.gmra.mxu3 %v359_v45 }
  0x82   : > { %413 = vmatmul.f32.gmra.mxu0 %v335_v46  ;;  %437 = vmatmul.f32.gmra.mxu1 %v343_v47 }
  0xc7   : > { %v393_v49 = vpop.f32.mrf.mxu0  ;;  %v417_v50 = vpop.f32.mrf.mxu1 }
  0xc8   : > { %v592_v51 = vadd.f32 %v1325_v48, %v393_v49  ;;  %v600_v52 = vadd.f32 %v1325_v48, %v417_v50 }
  0xca   : > { %v624_v53 = vmul.f32 0.01, %v592_v51  ;;  %v632_v54 = vmul.f32 0.01, %v600_v52 }
  0xcb   : > { %v441_v55 = vpop.f32.mrf.mxu2  ;;  %v465_v56 = vpop.f32.mrf.mxu3 }
  0xcc   : > { %v656_v57 = vmax.f32 %v592_v51, %v624_v53  ;;  %v664_v58 = vmax.f32 %v600_v52, %v632_v54  ;;  %v608_v59 = vadd.f32 %v1325_v48, %v441_v55  ;;  %v616_v60 = vadd.f32 %v1325_v48, %v465_v56 }
  0xce   : > { %688 = vst [vmem:[%s1333_s22] sm:$0xff] %v656_v57  ;;  %v640_v61 = vmul.f32 0.01, %v608_v59  ;;  %v648_v62 = vmul.f32 0.01, %v616_v60 }
  0xcf   : > { %696 = vst [vmem:[%s1333_s22 + $0x40] sm:$0xff] %v664_v58  ;;  %v396_v63 = vpop.f32.mrf.mxu0  ;;  %v420_v0 = vpop.f32.mrf.mxu1 }
  0xd0   : > { %v672_v1 = vmax.f32 %v608_v59, %v640_v61  ;;  %v680_v2 = vmax.f32 %v616_v60, %v648_v62  ;;  %v593_v3 = vadd.f32 %v1325_v48, %v396_v63  ;;  %v601_v4 = vadd.f32 %v1325_v48, %v420_v0 }
  0xd2   : > { %704 = vst [vmem:[%s1333_s22 + $0x80] sm:$0xff] %v672_v1  ;;  %v625_v5 = vmul.f32 0.01, %v593_v3  ;;  %v633_v6 = vmul.f32 0.01, %v601_v4 }
  0xd3   : > { %712 = vst [vmem:[%s1333_s22 + $0xc0] sm:$0xff] %v680_v2  ;;  %v444_v7 = vpop.f32.mrf.mxu2  ;;  %v468_v8 = vpop.f32.mrf.mxu3 }
  0xd4   : > { %v657_v9 = vmax.f32 %v593_v3, %v625_v5  ;;  %v665_v10 = vmax.f32 %v601_v4, %v633_v6  ;;  %v609_v11 = vadd.f32 %v1325_v48, %v444_v7  ;;  %v617_v12 = vadd.f32 %v1325_v48, %v468_v8 }
  0xd6   : > { %689 = vst [vmem:[%s1333_s22 + $0x8] sm:$0xff] %v657_v9  ;;  %v641_v13 = vmul.f32 0.01, %v609_v11  ;;  %v649_v14 = vmul.f32 0.01, %v617_v12 }
  0xd7   : > { %697 = vst [vmem:[%s1333_s22 + $0x48] sm:$0xff] %v665_v10  ;;  %v399_v15 = vpop.f32.mrf.mxu0  ;;  %v423_v16 = vpop.f32.mrf.mxu1 }
  0xd8   : > { %v673_v17 = vmax.f32 %v609_v11, %v641_v13  ;;  %v681_v18 = vmax.f32 %v617_v12, %v649_v14  ;;  %v594_v19 = vadd.f32 %v1325_v48, %v399_v15  ;;  %v602_v20 = vadd.f32 %v1325_v48, %v423_v16 }
  0xda   : > { %705 = vst [vmem:[%s1333_s22 + $0x88] sm:$0xff] %v673_v17  ;;  %v626_v21 = vmul.f32 0.01, %v594_v19  ;;  %v634_v22 = vmul.f32 0.01, %v602_v20 }
  0xdb   : > { %713 = vst [vmem:[%s1333_s22 + $0xc8] sm:$0xff] %v681_v18  ;;  %v447_v23 = vpop.f32.mrf.mxu2  ;;  %v471_v24 = vpop.f32.mrf.mxu3 }
  0xdc   : > { %v658_v25 = vmax.f32 %v594_v19, %v626_v21  ;;  %v666_v26 = vmax.f32 %v602_v20, %v634_v22  ;;  %v610_v27 = vadd.f32 %v1325_v48, %v447_v23  ;;  %v618_v28 = vadd.f32 %v1325_v48, %v471_v24 }
  0xde   : > { %690 = vst [vmem:[%s1333_s22 + $0x10] sm:$0xff] %v658_v25  ;;  %v642_v29 = vmul.f32 0.01, %v610_v27  ;;  %v650_v30 = vmul.f32 0.01, %v618_v28 }
  0xdf   : > { %698 = vst [vmem:[%s1333_s22 + $0x50] sm:$0xff] %v666_v26  ;;  %v402_v31 = vpop.f32.mrf.mxu0  ;;  %v426_v32 = vpop.f32.mrf.mxu1 }
  0xe0   : > { %v674_v33 = vmax.f32 %v610_v27, %v642_v29  ;;  %v682_v34 = vmax.f32 %v618_v28, %v650_v30  ;;  %v595_v35 = vadd.f32 %v1325_v48, %v402_v31  ;;  %v603_v36 = vadd.f32 %v1325_v48, %v426_v32 }
  0xe2   : > { %706 = vst [vmem:[%s1333_s22 + $0x90] sm:$0xff] %v674_v33  ;;  %v627_v37 = vmul.f32 0.01, %v595_v35  ;;  %v635_v38 = vmul.f32 0.01, %v603_v36 }
  0xe3   : > { %714 = vst [vmem:[%s1333_s22 + $0xd0] sm:$0xff] %v682_v34  ;;  %v450_v39 = vpop.f32.mrf.mxu2  ;;  %v474_v40 = vpop.f32.mrf.mxu3 }
  0xe4   : > { %v659_v41 = vmax.f32 %v595_v35, %v627_v37  ;;  %v667_v42 = vmax.f32 %v603_v36, %v635_v38  ;;  %v611_v43 = vadd.f32 %v1325_v48, %v450_v39  ;;  %v619_v44 = vadd.f32 %v1325_v48, %v474_v40 }
  0xe6   : > { %691 = vst [vmem:[%s1333_s22 + $0x18] sm:$0xff] %v659_v41  ;;  %v643_v45 = vmul.f32 0.01, %v611_v43  ;;  %v651_v46 = vmul.f32 0.01, %v619_v44 }
  0xe7   : > { %699 = vst [vmem:[%s1333_s22 + $0x58] sm:$0xff] %v667_v42  ;;  %v405_v47 = vpop.f32.mrf.mxu0  ;;  %v429_v49 = vpop.f32.mrf.mxu1 }
  0xe8   : > { %v675_v50 = vmax.f32 %v611_v43, %v643_v45  ;;  %v683_v51 = vmax.f32 %v619_v44, %v651_v46  ;;  %v596_v52 = vadd.f32 %v1325_v48, %v405_v47  ;;  %v604_v53 = vadd.f32 %v1325_v48, %v429_v49 }
  0xea   : > { %707 = vst [vmem:[%s1333_s22 + $0x98] sm:$0xff] %v675_v50  ;;  %v628_v54 = vmul.f32 0.01, %v596_v52  ;;  %v636_v55 = vmul.f32 0.01, %v604_v53 }
  0xeb   : > { %715 = vst [vmem:[%s1333_s22 + $0xd8] sm:$0xff] %v683_v51  ;;  %v453_v56 = vpop.f32.mrf.mxu2  ;;  %v477_v57 = vpop.f32.mrf.mxu3 }
  0xec   : > { %v660_v58 = vmax.f32 %v596_v52, %v628_v54  ;;  %v668_v59 = vmax.f32 %v604_v53, %v636_v55  ;;  %v612_v60 = vadd.f32 %v1325_v48, %v453_v56  ;;  %v620_v61 = vadd.f32 %v1325_v48, %v477_v57 }
  0xee   : > { %692 = vst [vmem:[%s1333_s22 + $0x20] sm:$0xff] %v660_v58  ;;  %v644_v62 = vmul.f32 0.01, %v612_v60  ;;  %v652_v63 = vmul.f32 0.01, %v620_v61 }
  0xef   : > { %700 = vst [vmem:[%s1333_s22 + $0x60] sm:$0xff] %v668_v59  ;;  %v408_v0 = vpop.f32.mrf.mxu0  ;;  %v432_v1 = vpop.f32.mrf.mxu1 }
  0xf0   : > { %v676_v2 = vmax.f32 %v612_v60, %v644_v62  ;;  %v684_v3 = vmax.f32 %v620_v61, %v652_v63  ;;  %v597_v4 = vadd.f32 %v1325_v48, %v408_v0  ;;  %v605_v5 = vadd.f32 %v1325_v48, %v432_v1 }
  0xf2   : > { %708 = vst [vmem:[%s1333_s22 + $0xa0] sm:$0xff] %v676_v2  ;;  %v629_v6 = vmul.f32 0.01, %v597_v4  ;;  %v637_v7 = vmul.f32 0.01, %v605_v5 }
  0xf3   : > { %716 = vst [vmem:[%s1333_s22 + $0xe0] sm:$0xff] %v684_v3  ;;  %v456_v8 = vpop.f32.mrf.mxu2  ;;  %v480_v9 = vpop.f32.mrf.mxu3 }
  0xf4   : > { %v661_v10 = vmax.f32 %v597_v4, %v629_v6  ;;  %v669_v11 = vmax.f32 %v605_v5, %v637_v7  ;;  %v613_v12 = vadd.f32 %v1325_v48, %v456_v8  ;;  %v621_v13 = vadd.f32 %v1325_v48, %v480_v9 }
  0xf6   : > { %693 = vst [vmem:[%s1333_s22 + $0x28] sm:$0xff] %v661_v10  ;;  %v645_v14 = vmul.f32 0.01, %v613_v12  ;;  %v653_v15 = vmul.f32 0.01, %v621_v13 }
  0xf7   : > { %701 = vst [vmem:[%s1333_s22 + $0x68] sm:$0xff] %v669_v11  ;;  %v411_v16 = vpop.f32.mrf.mxu0  ;;  %v435_v17 = vpop.f32.mrf.mxu1 }
  0xf8   : > { %v677_v18 = vmax.f32 %v613_v12, %v645_v14  ;;  %v685_v19 = vmax.f32 %v621_v13, %v653_v15  ;;  %v598_v20 = vadd.f32 %v1325_v48, %v411_v16  ;;  %v606_v21 = vadd.f32 %v1325_v48, %v435_v17 }
  0xfa   : > { %709 = vst [vmem:[%s1333_s22 + $0xa8] sm:$0xff] %v677_v18  ;;  %v630_v22 = vmul.f32 0.01, %v598_v20  ;;  %v638_v23 = vmul.f32 0.01, %v606_v21 }
  0xfb   : > { %717 = vst [vmem:[%s1333_s22 + $0xe8] sm:$0xff] %v685_v19  ;;  %v459_v24 = vpop.f32.mrf.mxu2  ;;  %v483_v25 = vpop.f32.mrf.mxu3 }
  0xfc   : > { %v662_v26 = vmax.f32 %v598_v20, %v630_v22  ;;  %v670_v27 = vmax.f32 %v606_v21, %v638_v23  ;;  %v614_v28 = vadd.f32 %v1325_v48, %v459_v24  ;;  %v622_v29 = vadd.f32 %v1325_v48, %v483_v25 }
  0xfe   : > { %694 = vst [vmem:[%s1333_s22 + $0x30] sm:$0xff] %v662_v26  ;;  %v646_v30 = vmul.f32 0.01, %v614_v28  ;;  %v654_v31 = vmul.f32 0.01, %v622_v29 }
  0xff   : > { %702 = vst [vmem:[%s1333_s22 + $0x70] sm:$0xff] %v670_v27  ;;  %v414_v32 = vpop.f32.mrf.mxu0  ;;  %v438_v33 = vpop.f32.mrf.mxu1 }
 0x100   : > { %v678_v34 = vmax.f32 %v614_v28, %v646_v30  ;;  %v686_v35 = vmax.f32 %v622_v29, %v654_v31  ;;  %v599_v36 = vadd.f32 %v1325_v48, %v414_v32  ;;  %v607_v37 = vadd.f32 %v1325_v48, %v438_v33 }
 0x102   : > { %710 = vst [vmem:[%s1333_s22 + $0xb0] sm:$0xff] %v678_v34  ;;  %v631_v38 = vmul.f32 0.01, %v599_v36  ;;  %v639_v39 = vmul.f32 0.01, %v607_v37 }
 0x103   : > { %718 = vst [vmem:[%s1333_s22 + $0xf0] sm:$0xff] %v686_v35  ;;  %v462_v40 = vpop.f32.mrf.mxu2  ;;  %v486_v41 = vpop.f32.mrf.mxu3 }
 0x104   : > { %v663_v42 = vmax.f32 %v599_v36, %v631_v38  ;;  %v671_v43 = vmax.f32 %v607_v37, %v639_v39  ;;  %v615_v44 = vadd.f32 %v1325_v48, %v462_v40  ;;  %v623_v45 = vadd.f32 %v1325_v48, %v486_v41 }
 0x106   : > { %695 = vst [vmem:[%s1333_s22 + $0x38] sm:$0xff] %v663_v42  ;;  %v647_v46 = vmul.f32 0.01, %v615_v44  ;;  %v655_v47 = vmul.f32 0.01, %v623_v45 }
 0x107   : > { %703 = vst [vmem:[%s1333_s22 + $0x78] sm:$0xff] %v671_v43 }
 0x108   : > { %v679_v49 = vmax.f32 %v615_v44, %v647_v46  ;;  %v687_v50 = vmax.f32 %v623_v45, %v655_v47 }
 0x10a   : > { %711 = vst [vmem:[%s1333_s22 + $0xb8] sm:$0xff] %v679_v49 }
 0x10b   : > { %719 = vst [vmem:[%s1333_s22 + $0xf8] sm:$0xff] %v687_v50 }
 0x10c   : > { %1084 = shalt.err (!%p1081_p12)
}
 0x10d   : > { %s1148_s6 = smov 128   ;;  %s1149_s7 = smov 8  }
 0x10e   : > { %925 = dma.vmem_to_hbm [thread:$0]  (%p1251_p3), %s735_s15, 4096, %s737_s19, %s721_s24, %s1148_s6, %s1148_s6, %s1149_s7  }
 0x10f PF: > { %p942_p13 = scmp.ge.s32.totalorder %s1143_s17, 2  ;;  %s751_s1 = sand.u32 1, %s1123_s12  }
 0x110   : > { %s752_s20 = scalar_lea.sflag [#allocation5], %s751_s1 }
 0x111   : > { %p936_p0 = pnand %p942_p13, %p1219_p6 }
 0x113   : > { %p937_p5 = pneg %p936_p0 }
 0x115   : > { %1118 = dma.done.wait (%p937_p5), %s752_s20, 4096  }
 0x116   : > { %1120 = vsyncadd (%p937_p5), %s752_s20, 4294963200  ;;  %s20_s17 = sadd.s32 1, %s1143_s17   ;;  %s1448_s12 = smov %s1127_s13 }
 0x117   : > { %p17_p7 = scmp.ge.s32.totalorder %s20_s17, 10   ;;  %s1449_s13 = smov %s1131_s14 }
 0x118   : > { %s1450_s14 = smov %s1260_s18  ;;  %s1451_s15 = smov %s1139_s16 }
 0x119   : > { %s1452_s16 = smov %s1454_s5  ;;  %19 = sbr.rel (!%p17_p7) target bundleno = 9 (0x9), region = 93 }
 0x11e   :  { %758 = vsyncpa [#allocation4], 1 }
 0x11f   :  { %760 = vsyncpa [#allocation4 + $0x1], 1 }
 0x120   :  { %761 = vsyncpa [#allocation7], 1 }
 0x121   :  { %762 = vsyncpa [#allocation5], 1 }
 0x122   :  { %764 = vsyncpa [#allocation5 + $0x1], 1 }

</bundles_post_ra>
